<compile_context>
chip_gen: v7x
topology: tpu7x:2x2x1
jax: 0.10.0
libtpu: 0.0.40
codegen_flags: <defaults>
</compile_context>

<pallas_src>
import jax
import jax.numpy as jnp
from jax.experimental import pallas as pl
from jax.experimental.pallas import tpu as pltpu

_MIB = 1024 * 1024


def _add_kernel(a_ref, b_ref, o_ref):
    o_ref[...] = a_ref[...] + b_ref[...]


def _sublane_multiple(dtype):
    # Minimum second-minor tile: 8 for 4-byte, 16 for 2-byte, 32 for 1-byte.
    return max(8, 32 // jnp.dtype(dtype).itemsize)


def _per_buffer_block_bytes():
    """Per-buffer VMEM block budget, sized per TPU generation.

    6 live buffers (3 arrays x double buffering) must fit comfortably in
    scoped VMEM: v2/v3 have tiny VMEM, v5e defaults to 16 MiB scoped,
    v6e/v7x default to 32 MiB scoped.
    """
    try:
        kind = jax.devices()[0].device_kind.lower()
    except Exception:
        kind = ""
    if "v2" in kind or "v3" in kind:
        return 1 * _MIB            # 6 x 1 MiB ~= 10 MiB with headroom
    if "v4" in kind or "v5" in kind:
        return 2 * _MIB            # 6 x 2 MiB = 12 MiB < 16 MiB scoped default
    return 4 * _MIB                # v6e / v7x / newer: 24 MiB < 32 MiB default


def pallas_add(a, b, *, xla_small_threshold_bytes=0):
    """out = a + b, streamed through VMEM at (near) HBM roofline."""
    assert a.shape == b.shape, (a.shape, b.shape)
    assert a.dtype == b.dtype, (a.dtype, b.dtype)
    shape = a.shape
    dtype = a.dtype
    n = a.size
    itemsize = jnp.dtype(dtype).itemsize
    nbytes = n * itemsize

    if n == 0:
        return a + b

    # Optional small-input fast path: below a few MiB the custom-call launch +
    # single non-overlapped pipeline step dominates, and XLA will fuse the add
    # into neighboring ops for free.  Off by default so the Pallas kernel is
    # always exercised here; production callers can pass e.g. 4 * _MIB.
    if nbytes <= xla_small_threshold_bytes:
        return a + b

    if n % 128 != 0:
        # Total element count is not lane-aligned, so a free 2-D reshape is
        # impossible.  Small/medium arrays run as a single full-array block
        # (block shape == full dims is always legal) -- no pad, no slice.
        if nbytes <= 2 * _MIB:
            return pl.pallas_call(
                _add_kernel,
                out_shape=jax.ShapeDtypeStruct(shape, dtype),
            )(a, b)
        # Rare large ragged case: XLA streams an elementwise add at HBM
        # roofline anyway, and avoiding a pad/copy matters more than Pallas.
        return a + b

    # ---- main path: lane-dense 2-D slab (n % 128 == 0) --------------------
    cols = 128
    for c in (1024, 512, 256):
        if n % c == 0:
            cols = c
            break
    rows = n // cols
    sub = _sublane_multiple(dtype)

    block_bytes = _per_buffer_block_bytes()
    tile_r = max(sub, (block_bytes // itemsize // cols) // sub * sub)
    if tile_r >= rows:
        tile_r = rows  # single block covering the whole slab (always legal)

    # Keep >= 2 grid steps for arrays worth pipelining so v7x can shard the
    # "parallel" axis across both TensorCores and the pipeline overlaps
    # fetch/compute/writeback.  Below ~1 MiB a single step is already ~free.
    if nbytes >= _MIB and rows >= 2 * sub and pl.cdiv(rows, tile_r) < 2:
        tile_r = pl.cdiv(pl.cdiv(rows, 2), sub) * sub

    grid = (pl.cdiv(rows, tile_r),)

    a2 = a.reshape(rows, cols)   # metadata-only reshape, no HBM traffic
    b2 = b.reshape(rows, cols)

    block_bytes_actual = tile_r * cols * itemsize
    vmem_limit = min(int(6 * block_bytes_actual + 4 * _MIB), 100 * _MIB)

    out2 = pl.pallas_call(
        _add_kernel,
        out_shape=jax.ShapeDtypeStruct((rows, cols), dtype),
        grid=grid,
        in_specs=[
            pl.BlockSpec((tile_r, cols), lambda i: (i, 0)),
            pl.BlockSpec((tile_r, cols), lambda i: (i, 0)),
        ],
        out_specs=pl.BlockSpec((tile_r, cols), lambda i: (i, 0)),
        compiler_params=pltpu.CompilerParams(
            dimension_semantics=("parallel",),
            vmem_limit_bytes=vmem_limit,
        ),
    )(a2, b2)

    return out2.reshape(shape)


if __name__ == "__main__":
    key = jax.random.PRNGKey(0)
    k1, k2, k3, k4, k5, k6 = jax.random.split(key, 6)

    # 1) The module's actual shape (NCHW elementwise add), f32.
    shape = (1, 96, 28, 28)
    x109 = jax.random.normal(k1, shape, dtype=jnp.float32)
    x103 = jax.random.normal(k2, shape, dtype=jnp.float32)
    out = pallas_add(x109, x103)
    jax.block_until_ready(out)
    assert out.shape == shape
    assert jnp.allclose(out, x109 + x103, atol=1e-6, rtol=1e-6)

    # 2) Same shape in bf16 (exercises the 16-sublane rounding logic).
    a_bf = x109.astype(jnp.bfloat16)
    b_bf = x103.astype(jnp.bfloat16)
    out_bf = pallas_add(a_bf, b_bf)
    jax.block_until_ready(out_bf)
    assert jnp.allclose(out_bf.astype(jnp.float32),
                        (a_bf + b_bf).astype(jnp.float32), atol=1e-2, rtol=1e-2)

    # 3) Larger aligned input: multi-block grid with a ragged last row block.
    big_shape = (2, 96, 56, 56)
    a_big = jax.random.normal(k3, big_shape, dtype=jnp.float32)
    b_big = jax.random.normal(k4, big_shape, dtype=jnp.float32)
    out_big = pallas_add(a_big, b_big)
    jax.block_until_ready(out_big)
    assert jnp.allclose(out_big, a_big + b_big, atol=1e-6, rtol=1e-6)

    # 4) Odd (non-128-divisible) size: single full-array block, no pad/slice.
    odd_shape = (3, 5, 7)
    a_odd = jax.random.normal(k5, odd_shape, dtype=jnp.float32)
    b_odd = jax.random.normal(k6, odd_shape, dtype=jnp.float32)
    out_odd = pallas_add(a_odd, b_odd)
    jax.block_until_ready(out_odd)
    assert out_odd.shape == odd_shape
    assert jnp.allclose(out_odd, a_odd + b_odd, atol=1e-6, rtol=1e-6)

    print("KERNEL_OK")
</pallas_src>

<mosaic_0001>
module attributes {stable_mosaic.version = 11 : i64} {
  func.func @_add_kernel(%arg0: i32, %arg1: memref<147x512xf32, #tpu.memory_space<vmem>>, %arg2: memref<147x512xf32, #tpu.memory_space<vmem>>, %arg3: memref<147x512xf32, #tpu.memory_space<vmem>>) attributes {dimension_semantics = [#tpu.dimension_semantics<parallel>], iteration_bounds = array<i64: 1>, scalar_prefetch = 0 : i64, scratch_operands = 0 : i64, tpu.core_type = #tpu.core_type<tc>, window_params = [{transform_indices = @transform_0, window_bounds = array<i64: 147, 512>}, {transform_indices = @transform_1, window_bounds = array<i64: 147, 512>}, {transform_indices = @transform_2, window_bounds = array<i64: 147, 512>}]} {
    %c0 = arith.constant 0 : index
    %c0_0 = arith.constant 0 : index
    %0 = vector.load %arg1[%c0, %c0_0] : memref<147x512xf32, #tpu.memory_space<vmem>>, vector<147x512xf32>
    %c0_1 = arith.constant 0 : index
    %c0_2 = arith.constant 0 : index
    %1 = vector.load %arg2[%c0_1, %c0_2] : memref<147x512xf32, #tpu.memory_space<vmem>>, vector<147x512xf32>
    %2 = arith.addf %0, %1 : vector<147x512xf32>
    %c0_3 = arith.constant 0 : index
    %c0_4 = arith.constant 0 : index
    %3 = vector.load %arg3[%c0_3, %c0_4] : memref<147x512xf32, #tpu.memory_space<vmem>>, vector<147x512xf32>
    tpu.vector_store %arg3[%c0_3, %c0_4], %2 {strides = array<i32>} : memref<147x512xf32, #tpu.memory_space<vmem>>, vector<147x512xf32>,
    return
  }
  func.func @transform_0(%arg0: i32) -> (i32, i32) {
    %c0_i32 = arith.constant 0 : i32
    %c0_i32_0 = arith.constant 0 : i32
    return %arg0, %c0_i32 : i32, i32
  }
  func.func @transform_1(%arg0: i32) -> (i32, i32) {
    %c0_i32 = arith.constant 0 : i32
    %c0_i32_0 = arith.constant 0 : i32
    return %arg0, %c0_i32 : i32, i32
  }
  func.func @transform_2(%arg0: i32) -> (i32, i32) {
    %c0_i32 = arith.constant 0 : i32
    %c0_i32_0 = arith.constant 0 : i32
    return %arg0, %c0_i32 : i32, i32
  }
}

</mosaic_0001>

<bundles_post_ra>
// kernel: tpu_custom_call.1
= control target key start
LH: loop header
LB: loop body
LE: loop exit
PB: predicated region body
PF: predicated region fallthrough
CT: control target
= control target key end

     0   :  { %7 = vsyncpa [#allocation3], 0  ;;  %s504_s0 = inlined_call_operand.hbm [shape: f32[147,512], index: 0, kind: input, shape index: {}]   ;;  %s505_s1 = inlined_call_operand.hbm [shape: f32[147,512], index: 1, kind: input, shape index: {}]   ;;  %s506_s2 = inlined_call_operand.hbm [shape: f32[147,512], index: 2, kind: output, shape index: {}]  }
   0x1   :  { %8 = vsyncpa [#allocation6], 0 }
   0x2   :  { %9 = vsyncpa [#allocation4], 0  ;;  %s439_s9 = smov [#allocation2]   ;;  %s367_s13 = scalar_lea.hbm %s504_s0, 9728 }
   0x3   :  { %s15_s10 = sshll.u32 %s439_s9, 4  ;;  %p368_p0 = scmp.ne.s32.totalorder %s504_s0, %s367_s13  ;;  %s16_s10 = int_to_ptr.vmem [resolvable:$true] %s15_s10 }
   0x4   :  { %p371_p1 = scmp.lt.u32.totalorder %s367_s13, %s504_s0 }
   0x6   :  { %p373_p2 = pnand %p371_p1, %p368_p0 }
   0x8   :  { %376 = shalt.err (!%p373_p2)
}
   0x9   :  { %s377_s18 = scalar_lea.vmem %s16_s10, 9728  ;;  %p382_p4 = scmp.lt.s32.totalorder %s16_s10, %s16_s10 }
   0xa   :  { %p378_p3 = scmp.ne.s32.totalorder %s16_s10, %s377_s18  ;;  %p383_p5 = scmp.lt.s32.totalorder %s377_s18, %s377_s18 }
   0xc   :  { %p384_p6 = por %p383_p5, %p382_p4 }
   0xe   :  { %p385_p7 = pnand %p384_p6, %p378_p3 }
  0x10   :  { %388 = shalt.err (!%p385_p7)
}
  0x11   :  { %s440_s19 = smov 512   ;;  %s441_s20 = smov 32  }
  0x12   :  { %21 = dma.hbm_to_vmem [thread:$0]  %s504_s0, 9728, %s16_s10, [#allocation3], %s440_s19, %s440_s19, %s441_s20  }
  0x13   :  { %s442_s23 = smov [#allocation5]   ;;  %s389_s27 = scalar_lea.hbm %s505_s1, 9728 }
  0x14   :  { %s27_s24 = sshll.u32 %s442_s23, 4  ;;  %p390_p8 = scmp.ne.s32.totalorder %s505_s1, %s389_s27  ;;  %s28_s24 = int_to_ptr.vmem [resolvable:$true] %s27_s24 }
  0x15   :  { %p393_p9 = scmp.lt.u32.totalorder %s389_s27, %s505_s1 }
  0x17   :  { %p395_p10 = pnand %p393_p9, %p390_p8 }
  0x19   :  { %398 = shalt.err (!%p395_p10)
}
  0x1a   :  { %s399_s4 = scalar_lea.vmem %s28_s24, 9728  ;;  %p404_p12 = scmp.lt.s32.totalorder %s28_s24, %s28_s24 }
  0x1b   :  { %p400_p11 = scmp.ne.s32.totalorder %s28_s24, %s399_s4  ;;  %p405_p13 = scmp.lt.s32.totalorder %s399_s4, %s399_s4 }
  0x1d   :  { %p406_p0 = por %p405_p13, %p404_p12 }
  0x1f   :  { %p407_p1 = pnand %p406_p0, %p400_p11 }
  0x21   :  { %410 = shalt.err (!%p407_p1)
}
  0x22   :  { %33 = dma.hbm_to_vmem [thread:$0]  %s505_s1, 9728, %s28_s24, [#allocation6], %s440_s19, %s440_s19, %s441_s20  }
  0x23   :  { %433 = dma.done.wait [#allocation3], 9728  }
  0x24   :  { %434 = vsyncadd [#allocation3], 4294957568 }
  0x25   :  { %435 = dma.done.wait [#allocation6], 9728  }
  0x26   :  { %436 = vsyncadd [#allocation6], 4294957568  ;;  %v40_v0 = vld [vmem:[#allocation2] sm:$0xff]  ;;  %v41_v2 = vld [vmem:[#allocation2 + $0x8] sm:$0xff]  ;;  %s443_s1 = smov [#allocation7]  }
  0x27   :  { %v116_v1 = vld [vmem:[#allocation5] sm:$0xff]  ;;  %v117_v4 = vld [vmem:[#allocation5 + $0x8] sm:$0xff]  ;;  %v42_v5 = vld [vmem:[#allocation2 + $0x10] sm:$0xff]  ;;  %s349_s6 = sshll.u32 %s443_s1, 4  ;;  %s350_s6 = int_to_ptr.vmem [resolvable:$true] %s349_s6 }
  0x28   :  { %v192_v3 = vadd.f32 %v116_v1, %v40_v0  ;;  %v118_v6 = vld [vmem:[#allocation5 + $0x10] sm:$0xff]  ;;  %v193_v7 = vadd.f32 %v117_v4, %v41_v2  ;;  %v43_v9 = vld [vmem:[#allocation2 + $0x18] sm:$0xff]  ;;  %v44_v11 = vld [vmem:[#allocation2 + $0x20] sm:$0xff]  ;;  %s411_s7 = scalar_lea.vmem %s350_s6, 9728  ;;  %p416_p3 = scmp.lt.s32.totalorder %s350_s6, %s350_s6 }
  0x29   :  { %v194_v8 = vadd.f32 %v118_v6, %v42_v5  ;;  %v119_v10 = vld [vmem:[#allocation5 + $0x18] sm:$0xff]  ;;  %v120_v13 = vld [vmem:[#allocation5 + $0x20] sm:$0xff]  ;;  %v45_v14 = vld [vmem:[#allocation2 + $0x28] sm:$0xff]  ;;  %p412_p2 = scmp.ne.s32.totalorder %s350_s6, %s411_s7  ;;  %p417_p4 = scmp.lt.s32.totalorder %s411_s7, %s411_s7 }
  0x2a   :  { %268 = vst [vmem:[#allocation7] sm:$0xff] %v192_v3  ;;  %v195_v12 = vadd.f32 %v119_v10, %v43_v9  ;;  %v121_v15 = vld [vmem:[#allocation5 + $0x28] sm:$0xff]  ;;  %269 = vst [vmem:[#allocation7 + $0x8] sm:$0xff] %v193_v7  ;;  %v196_v16 = vadd.f32 %v120_v13, %v44_v11  ;;  %v46_v18 = vld [vmem:[#allocation2 + $0x30] sm:$0xff] }
  0x2b   :  { %270 = vst [vmem:[#allocation7 + $0x10] sm:$0xff] %v194_v8  ;;  %v197_v17 = vadd.f32 %v121_v15, %v45_v14  ;;  %v122_v19 = vld [vmem:[#allocation5 + $0x30] sm:$0xff]  ;;  %v47_v20 = vld [vmem:[#allocation2 + $0x38] sm:$0xff]  ;;  %v48_v23 = vld [vmem:[#allocation2 + $0x40] sm:$0xff]  ;;  %p418_p5 = por %p417_p4, %p416_p3 }
  0x2c   :  { %271 = vst [vmem:[#allocation7 + $0x18] sm:$0xff] %v195_v12  ;;  %v198_v21 = vadd.f32 %v122_v19, %v46_v18  ;;  %v123_v22 = vld [vmem:[#allocation5 + $0x38] sm:$0xff]  ;;  %v124_v24 = vld [vmem:[#allocation5 + $0x40] sm:$0xff]  ;;  %272 = vst [vmem:[#allocation7 + $0x20] sm:$0xff] %v196_v16 }
  0x2d   :  { %273 = vst [vmem:[#allocation7 + $0x28] sm:$0xff] %v197_v17  ;;  %v199_v25 = vadd.f32 %v123_v22, %v47_v20  ;;  %v200_v26 = vadd.f32 %v124_v24, %v48_v23  ;;  %v49_v27 = vld [vmem:[#allocation2 + $0x48] sm:$0xff]  ;;  %v50_v29 = vld [vmem:[#allocation2 + $0x50] sm:$0xff]  ;;  %v51_v32 = vld [vmem:[#allocation2 + $0x58] sm:$0xff]  ;;  %p419_p6 = pnand %p418_p5, %p412_p2 }
  0x2e   :  { %v125_v28 = vld [vmem:[#allocation5 + $0x48] sm:$0xff]  ;;  %274 = vst [vmem:[#allocation7 + $0x30] sm:$0xff] %v198_v21  ;;  %v126_v31 = vld [vmem:[#allocation5 + $0x50] sm:$0xff]  ;;  %v127_v33 = vld [vmem:[#allocation5 + $0x58] sm:$0xff] }
  0x2f   :  { %v201_v30 = vadd.f32 %v125_v28, %v49_v27  ;;  %275 = vst [vmem:[#allocation7 + $0x38] sm:$0xff] %v199_v25  ;;  %276 = vst [vmem:[#allocation7 + $0x40] sm:$0xff] %v200_v26  ;;  %v202_v34 = vadd.f32 %v126_v31, %v50_v29  ;;  %v203_v35 = vadd.f32 %v127_v33, %v51_v32  ;;  %v52_v36 = vld [vmem:[#allocation2 + $0x60] sm:$0xff]  ;;  %v53_v38 = vld [vmem:[#allocation2 + $0x68] sm:$0xff] }
  0x30   :  { %v128_v37 = vld [vmem:[#allocation5 + $0x60] sm:$0xff]  ;;  %v129_v40 = vld [vmem:[#allocation5 + $0x68] sm:$0xff]  ;;  %v54_v41 = vld [vmem:[#allocation2 + $0x70] sm:$0xff] }
  0x31   :  { %277 = vst [vmem:[#allocation7 + $0x48] sm:$0xff] %v201_v30  ;;  %v204_v39 = vadd.f32 %v128_v37, %v52_v36  ;;  %v130_v42 = vld [vmem:[#allocation5 + $0x70] sm:$0xff]  ;;  %278 = vst [vmem:[#allocation7 + $0x50] sm:$0xff] %v202_v34  ;;  %v205_v43 = vadd.f32 %v129_v40, %v53_v38  ;;  %v55_v45 = vld [vmem:[#allocation2 + $0x78] sm:$0xff] }
  0x32   :  { %279 = vst [vmem:[#allocation7 + $0x58] sm:$0xff] %v203_v35  ;;  %v206_v44 = vadd.f32 %v130_v42, %v54_v41  ;;  %v131_v46 = vld [vmem:[#allocation5 + $0x78] sm:$0xff]  ;;  %v56_v47 = vld [vmem:[#allocation2 + $0x80] sm:$0xff]  ;;  %v57_v50 = vld [vmem:[#allocation2 + $0x88] sm:$0xff] }
  0x33   :  { %280 = vst [vmem:[#allocation7 + $0x60] sm:$0xff] %v204_v39  ;;  %v207_v48 = vadd.f32 %v131_v46, %v55_v45  ;;  %v132_v49 = vld [vmem:[#allocation5 + $0x80] sm:$0xff]  ;;  %v133_v51 = vld [vmem:[#allocation5 + $0x88] sm:$0xff]  ;;  %281 = vst [vmem:[#allocation7 + $0x68] sm:$0xff] %v205_v43 }
  0x34   :  { %282 = vst [vmem:[#allocation7 + $0x70] sm:$0xff] %v206_v44  ;;  %v208_v52 = vadd.f32 %v132_v49, %v56_v47  ;;  %v209_v53 = vadd.f32 %v133_v51, %v57_v50  ;;  %v58_v54 = vld [vmem:[#allocation2 + $0x90] sm:$0xff]  ;;  %v59_v56 = vld [vmem:[#allocation2 + $0x98] sm:$0xff]  ;;  %v60_v59 = vld [vmem:[#allocation2 + $0xa0] sm:$0xff] }
  0x35   :  { %v134_v55 = vld [vmem:[#allocation5 + $0x90] sm:$0xff]  ;;  %283 = vst [vmem:[#allocation7 + $0x78] sm:$0xff] %v207_v48  ;;  %v135_v58 = vld [vmem:[#allocation5 + $0x98] sm:$0xff]  ;;  %v136_v60 = vld [vmem:[#allocation5 + $0xa0] sm:$0xff] }
  0x36   :  { %v210_v57 = vadd.f32 %v134_v55, %v58_v54  ;;  %284 = vst [vmem:[#allocation7 + $0x80] sm:$0xff] %v208_v52  ;;  %285 = vst [vmem:[#allocation7 + $0x88] sm:$0xff] %v209_v53  ;;  %v211_v61 = vadd.f32 %v135_v58, %v59_v56  ;;  %v212_v62 = vadd.f32 %v136_v60, %v60_v59  ;;  %v61_v63 = vld [vmem:[#allocation2 + $0xa8] sm:$0xff]  ;;  %v62_v1 = vld [vmem:[#allocation2 + $0xb0] sm:$0xff] }
  0x37   :  { %v137_v0 = vld [vmem:[#allocation5 + $0xa8] sm:$0xff]  ;;  %v138_v3 = vld [vmem:[#allocation5 + $0xb0] sm:$0xff]  ;;  %v63_v4 = vld [vmem:[#allocation2 + $0xb8] sm:$0xff] }
  0x38   :  { %286 = vst [vmem:[#allocation7 + $0x90] sm:$0xff] %v210_v57  ;;  %v213_v2 = vadd.f32 %v137_v0, %v61_v63  ;;  %v139_v5 = vld [vmem:[#allocation5 + $0xb8] sm:$0xff]  ;;  %287 = vst [vmem:[#allocation7 + $0x98] sm:$0xff] %v211_v61  ;;  %v214_v6 = vadd.f32 %v138_v3, %v62_v1  ;;  %v64_v8 = vld [vmem:[#allocation2 + $0xc0] sm:$0xff] }
  0x39   :  { %288 = vst [vmem:[#allocation7 + $0xa0] sm:$0xff] %v212_v62  ;;  %v215_v7 = vadd.f32 %v139_v5, %v63_v4  ;;  %v140_v9 = vld [vmem:[#allocation5 + $0xc0] sm:$0xff]  ;;  %v65_v10 = vld [vmem:[#allocation2 + $0xc8] sm:$0xff]  ;;  %v66_v13 = vld [vmem:[#allocation2 + $0xd0] sm:$0xff] }
  0x3a   :  { %289 = vst [vmem:[#allocation7 + $0xa8] sm:$0xff] %v213_v2  ;;  %v216_v11 = vadd.f32 %v140_v9, %v64_v8  ;;  %v141_v12 = vld [vmem:[#allocation5 + $0xc8] sm:$0xff]  ;;  %v142_v14 = vld [vmem:[#allocation5 + $0xd0] sm:$0xff]  ;;  %290 = vst [vmem:[#allocation7 + $0xb0] sm:$0xff] %v214_v6 }
  0x3b   :  { %291 = vst [vmem:[#allocation7 + $0xb8] sm:$0xff] %v215_v7  ;;  %v217_v15 = vadd.f32 %v141_v12, %v65_v10  ;;  %v218_v16 = vadd.f32 %v142_v14, %v66_v13  ;;  %v67_v17 = vld [vmem:[#allocation2 + $0xd8] sm:$0xff]  ;;  %v68_v19 = vld [vmem:[#allocation2 + $0xe0] sm:$0xff]  ;;  %v69_v22 = vld [vmem:[#allocation2 + $0xe8] sm:$0xff] }
  0x3c   :  { %v143_v18 = vld [vmem:[#allocation5 + $0xd8] sm:$0xff]  ;;  %292 = vst [vmem:[#allocation7 + $0xc0] sm:$0xff] %v216_v11  ;;  %v144_v21 = vld [vmem:[#allocation5 + $0xe0] sm:$0xff]  ;;  %v145_v23 = vld [vmem:[#allocation5 + $0xe8] sm:$0xff] }
  0x3d   :  { %v219_v20 = vadd.f32 %v143_v18, %v67_v17  ;;  %293 = vst [vmem:[#allocation7 + $0xc8] sm:$0xff] %v217_v15  ;;  %294 = vst [vmem:[#allocation7 + $0xd0] sm:$0xff] %v218_v16  ;;  %v220_v24 = vadd.f32 %v144_v21, %v68_v19  ;;  %v221_v25 = vadd.f32 %v145_v23, %v69_v22  ;;  %v70_v26 = vld [vmem:[#allocation2 + $0xf0] sm:$0xff]  ;;  %v71_v28 = vld [vmem:[#allocation2 + $0xf8] sm:$0xff] }
  0x3e   :  { %v146_v27 = vld [vmem:[#allocation5 + $0xf0] sm:$0xff]  ;;  %v147_v30 = vld [vmem:[#allocation5 + $0xf8] sm:$0xff]  ;;  %v72_v31 = vld [vmem:[#allocation2 + $0x100] sm:$0xff] }
  0x3f   :  { %295 = vst [vmem:[#allocation7 + $0xd8] sm:$0xff] %v219_v20  ;;  %v222_v29 = vadd.f32 %v146_v27, %v70_v26  ;;  %v148_v32 = vld [vmem:[#allocation5 + $0x100] sm:$0xff]  ;;  %296 = vst [vmem:[#allocation7 + $0xe0] sm:$0xff] %v220_v24  ;;  %v223_v33 = vadd.f32 %v147_v30, %v71_v28  ;;  %v73_v35 = vld [vmem:[#allocation2 + $0x108] sm:$0xff] }
  0x40   :  { %297 = vst [vmem:[#allocation7 + $0xe8] sm:$0xff] %v221_v25  ;;  %v224_v34 = vadd.f32 %v148_v32, %v72_v31  ;;  %v149_v36 = vld [vmem:[#allocation5 + $0x108] sm:$0xff]  ;;  %v74_v37 = vld [vmem:[#allocation2 + $0x110] sm:$0xff]  ;;  %v75_v40 = vld [vmem:[#allocation2 + $0x118] sm:$0xff] }
  0x41   :  { %298 = vst [vmem:[#allocation7 + $0xf0] sm:$0xff] %v222_v29  ;;  %v225_v38 = vadd.f32 %v149_v36, %v73_v35  ;;  %v150_v39 = vld [vmem:[#allocation5 + $0x110] sm:$0xff]  ;;  %v151_v41 = vld [vmem:[#allocation5 + $0x118] sm:$0xff]  ;;  %299 = vst [vmem:[#allocation7 + $0xf8] sm:$0xff] %v223_v33 }
  0x42   :  { %300 = vst [vmem:[#allocation7 + $0x100] sm:$0xff] %v224_v34  ;;  %v226_v42 = vadd.f32 %v150_v39, %v74_v37  ;;  %v227_v43 = vadd.f32 %v151_v41, %v75_v40  ;;  %v76_v44 = vld [vmem:[#allocation2 + $0x120] sm:$0xff]  ;;  %v77_v46 = vld [vmem:[#allocation2 + $0x128] sm:$0xff]  ;;  %v78_v49 = vld [vmem:[#allocation2 + $0x130] sm:$0xff] }
  0x43   :  { %v152_v45 = vld [vmem:[#allocation5 + $0x120] sm:$0xff]  ;;  %301 = vst [vmem:[#allocation7 + $0x108] sm:$0xff] %v225_v38  ;;  %v153_v48 = vld [vmem:[#allocation5 + $0x128] sm:$0xff]  ;;  %v154_v50 = vld [vmem:[#allocation5 + $0x130] sm:$0xff] }
  0x44   :  { %v228_v47 = vadd.f32 %v152_v45, %v76_v44  ;;  %302 = vst [vmem:[#allocation7 + $0x110] sm:$0xff] %v226_v42  ;;  %303 = vst [vmem:[#allocation7 + $0x118] sm:$0xff] %v227_v43  ;;  %v229_v51 = vadd.f32 %v153_v48, %v77_v46  ;;  %v230_v52 = vadd.f32 %v154_v50, %v78_v49  ;;  %v79_v53 = vld [vmem:[#allocation2 + $0x138] sm:$0xff]  ;;  %v80_v55 = vld [vmem:[#allocation2 + $0x140] sm:$0xff] }
  0x45   :  { %v155_v54 = vld [vmem:[#allocation5 + $0x138] sm:$0xff]  ;;  %v156_v57 = vld [vmem:[#allocation5 + $0x140] sm:$0xff]  ;;  %v81_v58 = vld [vmem:[#allocation2 + $0x148] sm:$0xff] }
  0x46   :  { %304 = vst [vmem:[#allocation7 + $0x120] sm:$0xff] %v228_v47  ;;  %v231_v56 = vadd.f32 %v155_v54, %v79_v53  ;;  %v157_v59 = vld [vmem:[#allocation5 + $0x148] sm:$0xff]  ;;  %305 = vst [vmem:[#allocation7 + $0x128] sm:$0xff] %v229_v51  ;;  %v232_v60 = vadd.f32 %v156_v57, %v80_v55  ;;  %v82_v62 = vld [vmem:[#allocation2 + $0x150] sm:$0xff] }
  0x47   :  { %306 = vst [vmem:[#allocation7 + $0x130] sm:$0xff] %v230_v52  ;;  %v233_v61 = vadd.f32 %v157_v59, %v81_v58  ;;  %v158_v63 = vld [vmem:[#allocation5 + $0x150] sm:$0xff]  ;;  %v83_v0 = vld [vmem:[#allocation2 + $0x158] sm:$0xff]  ;;  %v84_v3 = vld [vmem:[#allocation2 + $0x160] sm:$0xff] }
  0x48   :  { %307 = vst [vmem:[#allocation7 + $0x138] sm:$0xff] %v231_v56  ;;  %v234_v1 = vadd.f32 %v158_v63, %v82_v62  ;;  %v159_v2 = vld [vmem:[#allocation5 + $0x158] sm:$0xff]  ;;  %v160_v4 = vld [vmem:[#allocation5 + $0x160] sm:$0xff]  ;;  %308 = vst [vmem:[#allocation7 + $0x140] sm:$0xff] %v232_v60 }
  0x49   :  { %309 = vst [vmem:[#allocation7 + $0x148] sm:$0xff] %v233_v61  ;;  %v235_v5 = vadd.f32 %v159_v2, %v83_v0  ;;  %v236_v6 = vadd.f32 %v160_v4, %v84_v3  ;;  %v85_v7 = vld [vmem:[#allocation2 + $0x168] sm:$0xff]  ;;  %v86_v9 = vld [vmem:[#allocation2 + $0x170] sm:$0xff]  ;;  %v87_v12 = vld [vmem:[#allocation2 + $0x178] sm:$0xff] }
  0x4a   :  { %v161_v8 = vld [vmem:[#allocation5 + $0x168] sm:$0xff]  ;;  %310 = vst [vmem:[#allocation7 + $0x150] sm:$0xff] %v234_v1  ;;  %v162_v11 = vld [vmem:[#allocation5 + $0x170] sm:$0xff]  ;;  %v163_v13 = vld [vmem:[#allocation5 + $0x178] sm:$0xff] }
  0x4b   :  { %v237_v10 = vadd.f32 %v161_v8, %v85_v7  ;;  %311 = vst [vmem:[#allocation7 + $0x158] sm:$0xff] %v235_v5  ;;  %312 = vst [vmem:[#allocation7 + $0x160] sm:$0xff] %v236_v6  ;;  %v238_v14 = vadd.f32 %v162_v11, %v86_v9  ;;  %v239_v15 = vadd.f32 %v163_v13, %v87_v12  ;;  %v88_v16 = vld [vmem:[#allocation2 + $0x180] sm:$0xff]  ;;  %v89_v18 = vld [vmem:[#allocation2 + $0x188] sm:$0xff] }
  0x4c   :  { %v164_v17 = vld [vmem:[#allocation5 + $0x180] sm:$0xff]  ;;  %v165_v20 = vld [vmem:[#allocation5 + $0x188] sm:$0xff]  ;;  %v90_v21 = vld [vmem:[#allocation2 + $0x190] sm:$0xff] }
  0x4d   :  { %313 = vst [vmem:[#allocation7 + $0x168] sm:$0xff] %v237_v10  ;;  %v240_v19 = vadd.f32 %v164_v17, %v88_v16  ;;  %v166_v22 = vld [vmem:[#allocation5 + $0x190] sm:$0xff]  ;;  %314 = vst [vmem:[#allocation7 + $0x170] sm:$0xff] %v238_v14  ;;  %v241_v23 = vadd.f32 %v165_v20, %v89_v18  ;;  %v91_v25 = vld [vmem:[#allocation2 + $0x198] sm:$0xff] }
  0x4e   :  { %315 = vst [vmem:[#allocation7 + $0x178] sm:$0xff] %v239_v15  ;;  %v242_v24 = vadd.f32 %v166_v22, %v90_v21  ;;  %v167_v26 = vld [vmem:[#allocation5 + $0x198] sm:$0xff]  ;;  %v92_v27 = vld [vmem:[#allocation2 + $0x1a0] sm:$0xff]  ;;  %v93_v30 = vld [vmem:[#allocation2 + $0x1a8] sm:$0xff] }
  0x4f   :  { %316 = vst [vmem:[#allocation7 + $0x180] sm:$0xff] %v240_v19  ;;  %v243_v28 = vadd.f32 %v167_v26, %v91_v25  ;;  %v168_v29 = vld [vmem:[#allocation5 + $0x1a0] sm:$0xff]  ;;  %v169_v31 = vld [vmem:[#allocation5 + $0x1a8] sm:$0xff]  ;;  %317 = vst [vmem:[#allocation7 + $0x188] sm:$0xff] %v241_v23 }
  0x50   :  { %318 = vst [vmem:[#allocation7 + $0x190] sm:$0xff] %v242_v24  ;;  %v244_v32 = vadd.f32 %v168_v29, %v92_v27  ;;  %v245_v33 = vadd.f32 %v169_v31, %v93_v30  ;;  %v94_v34 = vld [vmem:[#allocation2 + $0x1b0] sm:$0xff]  ;;  %v95_v36 = vld [vmem:[#allocation2 + $0x1b8] sm:$0xff]  ;;  %v96_v39 = vld [vmem:[#allocation2 + $0x1c0] sm:$0xff] }
  0x51   :  { %v170_v35 = vld [vmem:[#allocation5 + $0x1b0] sm:$0xff]  ;;  %319 = vst [vmem:[#allocation7 + $0x198] sm:$0xff] %v243_v28  ;;  %v171_v38 = vld [vmem:[#allocation5 + $0x1b8] sm:$0xff]  ;;  %v172_v40 = vld [vmem:[#allocation5 + $0x1c0] sm:$0xff] }
  0x52   :  { %v246_v37 = vadd.f32 %v170_v35, %v94_v34  ;;  %320 = vst [vmem:[#allocation7 + $0x1a0] sm:$0xff] %v244_v32  ;;  %321 = vst [vmem:[#allocation7 + $0x1a8] sm:$0xff] %v245_v33  ;;  %v247_v41 = vadd.f32 %v171_v38, %v95_v36  ;;  %v248_v42 = vadd.f32 %v172_v40, %v96_v39  ;;  %v97_v43 = vld [vmem:[#allocation2 + $0x1c8] sm:$0xff]  ;;  %v98_v45 = vld [vmem:[#allocation2 + $0x1d0] sm:$0xff] }
  0x53   :  { %v173_v44 = vld [vmem:[#allocation5 + $0x1c8] sm:$0xff]  ;;  %v174_v47 = vld [vmem:[#allocation5 + $0x1d0] sm:$0xff]  ;;  %v99_v48 = vld [vmem:[#allocation2 + $0x1d8] sm:$0xff] }
  0x54   :  { %322 = vst [vmem:[#allocation7 + $0x1b0] sm:$0xff] %v246_v37  ;;  %v249_v46 = vadd.f32 %v173_v44, %v97_v43  ;;  %v175_v49 = vld [vmem:[#allocation5 + $0x1d8] sm:$0xff]  ;;  %323 = vst [vmem:[#allocation7 + $0x1b8] sm:$0xff] %v247_v41  ;;  %v250_v50 = vadd.f32 %v174_v47, %v98_v45  ;;  %v100_v52 = vld [vmem:[#allocation2 + $0x1e0] sm:$0xff] }
  0x55   :  { %324 = vst [vmem:[#allocation7 + $0x1c0] sm:$0xff] %v248_v42  ;;  %v251_v51 = vadd.f32 %v175_v49, %v99_v48  ;;  %v176_v53 = vld [vmem:[#allocation5 + $0x1e0] sm:$0xff]  ;;  %v101_v54 = vld [vmem:[#allocation2 + $0x1e8] sm:$0xff]  ;;  %v102_v57 = vld [vmem:[#allocation2 + $0x1f0] sm:$0xff] }
  0x56   :  { %325 = vst [vmem:[#allocation7 + $0x1c8] sm:$0xff] %v249_v46  ;;  %v252_v55 = vadd.f32 %v176_v53, %v100_v52  ;;  %v177_v56 = vld [vmem:[#allocation5 + $0x1e8] sm:$0xff]  ;;  %v178_v58 = vld [vmem:[#allocation5 + $0x1f0] sm:$0xff]  ;;  %326 = vst [vmem:[#allocation7 + $0x1d0] sm:$0xff] %v250_v50 }
  0x57   :  { %327 = vst [vmem:[#allocation7 + $0x1d8] sm:$0xff] %v251_v51  ;;  %v253_v59 = vadd.f32 %v177_v56, %v101_v54  ;;  %v254_v60 = vadd.f32 %v178_v58, %v102_v57  ;;  %v103_v61 = vld [vmem:[#allocation2 + $0x1f8] sm:$0xff]  ;;  %v104_v63 = vld [vmem:[#allocation2 + $0x200] sm:$0xff]  ;;  %v105_v2 = vld [vmem:[#allocation2 + $0x208] sm:$0xff] }
  0x58   :  { %v179_v62 = vld [vmem:[#allocation5 + $0x1f8] sm:$0xff]  ;;  %328 = vst [vmem:[#allocation7 + $0x1e0] sm:$0xff] %v252_v55  ;;  %v180_v1 = vld [vmem:[#allocation5 + $0x200] sm:$0xff]  ;;  %v181_v3 = vld [vmem:[#allocation5 + $0x208] sm:$0xff] }
  0x59   :  { %v255_v0 = vadd.f32 %v179_v62, %v103_v61  ;;  %329 = vst [vmem:[#allocation7 + $0x1e8] sm:$0xff] %v253_v59  ;;  %330 = vst [vmem:[#allocation7 + $0x1f0] sm:$0xff] %v254_v60  ;;  %v256_v4 = vadd.f32 %v180_v1, %v104_v63  ;;  %v257_v5 = vadd.f32 %v181_v3, %v105_v2  ;;  %v106_v6 = vld [vmem:[#allocation2 + $0x210] sm:$0xff]  ;;  %v107_v8 = vld [vmem:[#allocation2 + $0x218] sm:$0xff] }
  0x5a   :  { %v182_v7 = vld [vmem:[#allocation5 + $0x210] sm:$0xff]  ;;  %v183_v10 = vld [vmem:[#allocation5 + $0x218] sm:$0xff]  ;;  %v108_v11 = vld [vmem:[#allocation2 + $0x220] sm:$0xff] }
  0x5b   :  { %331 = vst [vmem:[#allocation7 + $0x1f8] sm:$0xff] %v255_v0  ;;  %v258_v9 = vadd.f32 %v182_v7, %v106_v6  ;;  %v184_v12 = vld [vmem:[#allocation5 + $0x220] sm:$0xff]  ;;  %332 = vst [vmem:[#allocation7 + $0x200] sm:$0xff] %v256_v4  ;;  %v259_v13 = vadd.f32 %v183_v10, %v107_v8  ;;  %v109_v15 = vld [vmem:[#allocation2 + $0x228] sm:$0xff] }
  0x5c   :  { %333 = vst [vmem:[#allocation7 + $0x208] sm:$0xff] %v257_v5  ;;  %v260_v14 = vadd.f32 %v184_v12, %v108_v11  ;;  %v185_v16 = vld [vmem:[#allocation5 + $0x228] sm:$0xff]  ;;  %v110_v17 = vld [vmem:[#allocation2 + $0x230] sm:$0xff]  ;;  %v111_v20 = vld [vmem:[#allocation2 + $0x238] sm:$0xff] }
  0x5d   :  { %334 = vst [vmem:[#allocation7 + $0x210] sm:$0xff] %v258_v9  ;;  %v261_v18 = vadd.f32 %v185_v16, %v109_v15  ;;  %v186_v19 = vld [vmem:[#allocation5 + $0x230] sm:$0xff]  ;;  %v187_v21 = vld [vmem:[#allocation5 + $0x238] sm:$0xff]  ;;  %335 = vst [vmem:[#allocation7 + $0x218] sm:$0xff] %v259_v13 }
  0x5e   :  { %336 = vst [vmem:[#allocation7 + $0x220] sm:$0xff] %v260_v14  ;;  %v262_v22 = vadd.f32 %v186_v19, %v110_v17  ;;  %v263_v23 = vadd.f32 %v187_v21, %v111_v20  ;;  %v112_v24 = vld [vmem:[#allocation2 + $0x240] sm:$0x7]  ;;  %v113_v26 = vld [vmem:[#allocation2 + $0x248] sm:$0x7] }
  0x5f   :  { %v188_v25 = vld [vmem:[#allocation5 + $0x240] sm:$0x7]  ;;  %337 = vst [vmem:[#allocation7 + $0x228] sm:$0xff] %v261_v18  ;;  %v189_v28 = vld [vmem:[#allocation5 + $0x248] sm:$0x7] }
  0x60   :  { %v264_v27 = vadd.f32 %v188_v25, %v112_v24  ;;  %v114_v29 = vld [vmem:[#allocation2 + $0x250] sm:$0x7]  ;;  %338 = vst [vmem:[#allocation7 + $0x230] sm:$0xff] %v262_v22  ;;  %339 = vst [vmem:[#allocation7 + $0x238] sm:$0xff] %v263_v23  ;;  %v265_v31 = vadd.f32 %v189_v28, %v113_v26  ;;  %v115_v33 = vld [vmem:[#allocation2 + $0x258] sm:$0x7] }
  0x61   :  { %v190_v30 = vld [vmem:[#allocation5 + $0x250] sm:$0x7]  ;;  %v191_v34 = vld [vmem:[#allocation5 + $0x258] sm:$0x7] }
  0x62   :  { %v266_v32 = vadd.f32 %v190_v30, %v114_v29  ;;  %340 = vst [vmem:[#allocation7 + $0x240] sm:$0x7] %v264_v27  ;;  %v267_v35 = vadd.f32 %v191_v34, %v115_v33  ;;  %341 = vst [vmem:[#allocation7 + $0x248] sm:$0x7] %v265_v31 }
  0x64   :  { %342 = vst [vmem:[#allocation7 + $0x250] sm:$0x7] %v266_v32  ;;  %343 = vst [vmem:[#allocation7 + $0x258] sm:$0x7] %v267_v35 }
  0x65   :  { %422 = shalt.err (!%p419_p6)
}
  0x66   :  { %s423_s10 = scalar_lea.hbm %s506_s2, 9728 }
  0x67   :  { %p424_p7 = scmp.ne.s32.totalorder %s506_s2, %s423_s10  ;;  %p427_p8 = scmp.lt.u32.totalorder %s423_s10, %s506_s2 }
  0x69   :  { %p429_p9 = pnand %p427_p8, %p424_p7 }
  0x6b   :  { %432 = shalt.err (!%p429_p9)
}
  0x6c   :  { %355 = dma.vmem_to_hbm [thread:$0]  %s350_s6, 9728, %s506_s2, [#allocation4], %s440_s19, %s440_s19, %s441_s20  }
  0x6d   :  { %437 = dma.done.wait [#allocation4], 9728  }
  0x6e   :  { %438 = vsyncadd [#allocation4], 4294957568 }
  0x6f   :  { %359 = vsyncpa [#allocation3], 1 }
  0x70   :  { %360 = vsyncpa [#allocation6], 1 }
  0x71   :  { %361 = vsyncpa [#allocation4], 1 }

</bundles_post_ra>
